<compile_context>
chip_gen: v6e
topology: v6e:2x2x1
jax: 0.10.0
libtpu: 0.0.40
codegen_flags: <defaults>
</compile_context>

<pallas_src>
import functools

import jax
import jax.numpy as jnp
from jax.experimental import pallas as pl
from jax.experimental.pallas import tpu as pltpu

EPS = 1e-5
K_SIZE = 7
STRIDE = 2
PAD = 3
LANE = 128
SUB = 8
NUM_CORES = 2  # stats-pass megacore split (v7x); harmless serial loop on v5e/v6e


def _round_up(x, m):
    return (x + m - 1) // m * m


def _vmem_limit_bytes():
    # Generation-aware scoped-VMEM budget: half of physical VMEM, clamped to
    # [32 MiB, 100 MiB] (v7x: 64 MiB physical -> 32 MiB; v5e/v6e: 128 -> 64 MiB).
    default = 32 * 1024 * 1024
    try:
        phys = int(pltpu.get_tpu_info().vmem_capacity_bytes)
    except Exception:  # pragma: no cover - conservative fallback
        return default
    return int(min(max(phys // 2, default), 100 * 1024 * 1024))


# ---------------------------------------------------------------------------
# Pass 1: conv tile as a (Cout8, K) @ (K, TILE_M) MXU GEMM (bf16 in, f32 acc),
# stash the f32 conv tile, and accumulate per-core per-channel sum / sum-of-
# squares into core-resident (Cout8, 1) output blocks.
# ---------------------------------------------------------------------------
def _conv_stats_kernel(w_ref, p_ref, convt_ref, sum_ref, sumsq_ref):
    i = pl.program_id(1)  # tile index within this core's slice of M

    @pl.when(i == 0)
    def _init():
        sum_ref[...] = jnp.zeros_like(sum_ref)
        sumsq_ref[...] = jnp.zeros_like(sumsq_ref)

    conv_t = jnp.dot(w_ref[...], p_ref[...],
                     preferred_element_type=jnp.float32)        # (Cout8, TILE_M) f32
    convt_ref[...] = conv_t                                     # f32 stash for pass 2

    # Lane-dim (pixel) reductions in f32.  (If the vector slots ever saturate on
    # v5e this can move to the MXU as conv_t @ ones((TILE_M, 1)); the kernel is
    # HBM-bound today so the VPU/XLU have slack.)
    sum_ref[...] += jnp.sum(conv_t, axis=1, keepdims=True)
    sumsq_ref[...] += jnp.sum(conv_t * conv_t, axis=1, keepdims=True)


# ---------------------------------------------------------------------------
# Pass 2: pure elementwise folded-BN affine + ReLU over the conv stash,
# in place (aliased), channels on sublanes so scale/shift are (Cout8, 1).
# ---------------------------------------------------------------------------
def _bn_relu_kernel(convt_ref, scale_ref, shift_ref, o_ref):
    y = convt_ref[...] * scale_ref[...] + shift_ref[...]
    o_ref[...] = jnp.maximum(y, 0.0).astype(o_ref.dtype)


def _im2col_t_bf16(x_nchw):
    """7x7 / stride-2 / pad-3 patches in transposed (K, M) layout, bf16.

    K = Cin*49 flattened in (c, kh, kw) order (matches conv_w.reshape(Cout, -1)),
    M = N*Ho*Wo flattened in (n, ho, wo) order.
    """
    N, C, H, W = x_nchw.shape
    Ho = (H + 2 * PAD - K_SIZE) // STRIDE + 1
    Wo = (W + 2 * PAD - K_SIZE) // STRIDE + 1
    xp = jnp.pad(x_nchw.astype(jnp.bfloat16),
                 ((0, 0), (0, 0), (PAD, PAD), (PAD, PAD)))
    cols = []
    for kh in range(K_SIZE):
        for kw in range(K_SIZE):
            cols.append(xp[:, :, kh:kh + STRIDE * Ho:STRIDE, kw:kw + STRIDE * Wo:STRIDE])
    pt = jnp.stack(cols, axis=0)                  # (49, N, C, Ho, Wo), axis0 = (kh, kw)
    pt = pt.transpose(2, 0, 1, 3, 4)              # (C, 49, N, Ho, Wo)
    patches_t = pt.reshape(C * K_SIZE * K_SIZE, N * Ho * Wo)
    return patches_t, (N, Ho, Wo)


def gate_forward(x_nchw, conv_w, gamma, beta, *, tile_m=2048):
    """Matches PyTorch Gate.forward: relu(bn1(conv1(x))), training-mode batch stats.

    x_nchw: (N, Cin, H, W); conv_w: (Cout, Cin, 7, 7); gamma/beta: (Cout,)
    Returns (N, Cout, Ho, Wo) in f32.
    """
    Cout, Cin, _, _ = conv_w.shape
    patches_t, (N, Ho, Wo) = _im2col_t_bf16(x_nchw)            # (K, M) bf16
    K, M = patches_t.shape

    # Channels live on sublanes -> pad Cout to a multiple of 8 only (not 128).
    CO8 = _round_up(max(Cout, SUB), SUB)

    # tile_m is the lane dim of every block -> multiple of 128; avoid creating
    # more padding than one core-slice of work.
    tile_m = min(tile_m, _round_up(-(-M // NUM_CORES), LANE))
    tile_m = _round_up(max(tile_m, LANE), LANE)
    M_pad = _round_up(M, NUM_CORES * tile_m)
    if M_pad != M:
        patches_t = jnp.pad(patches_t, ((0, 0), (0, M_pad - M)))  # zero cols -> conv == 0

    # (Cout, Cin, 7, 7) -> (CO8, K) bf16, zero-padded rows; (c, kh, kw) flattening
    # matches the patch K order above.
    w2 = conv_w.reshape(Cout, K).astype(jnp.bfloat16)
    w2 = jnp.zeros((CO8, K), jnp.bfloat16).at[:Cout, :].set(w2)

    tiles_per_core = M_pad // (NUM_CORES * tile_m)
    vmem_limit = _vmem_limit_bytes()

    w_spec = pl.BlockSpec((CO8, K), lambda c, i: (0, 0))
    p_spec = pl.BlockSpec((K, tile_m), lambda c, i: (0, c * tiles_per_core + i))
    convt_spec = pl.BlockSpec((CO8, tile_m), lambda c, i: (0, c * tiles_per_core + i))
    stat_spec = pl.BlockSpec((CO8, 1), lambda c, i: (c, 0))     # per-core partials

    # ---- pass 1: conv GEMM + f32 conv stash + per-core batch-stat partials ----
    conv_stash, ch_sum, ch_sumsq = pl.pallas_call(
        _conv_stats_kernel,
        out_shape=(jax.ShapeDtypeStruct((CO8, M_pad), jnp.float32),
                   jax.ShapeDtypeStruct((NUM_CORES * CO8, 1), jnp.float32),
                   jax.ShapeDtypeStruct((NUM_CORES * CO8, 1), jnp.float32)),
        grid=(NUM_CORES, tiles_per_core),
        in_specs=[w_spec, p_spec],
        out_specs=(convt_spec, stat_spec, stat_spec),
        compiler_params=pltpu.CompilerParams(
            dimension_semantics=("parallel", "arbitrary"),
            vmem_limit_bytes=vmem_limit),
    )(w2, patches_t)

    # Combine per-core partials and fold BN (biased variance, eps) into one
    # per-channel affine.  Padded pixels contributed conv == 0 (no bias), so we
    # divide by the real M and the statistics stay exact.
    # NOTE: E[x^2]-E[x]^2 in f32 can cancel when |mean| >> std per channel
    # (documented limitation; fine for a first conv on normalized inputs).
    s = ch_sum.reshape(NUM_CORES, CO8, 1).sum(axis=0)           # (CO8, 1)
    sq = ch_sumsq.reshape(NUM_CORES, CO8, 1).sum(axis=0)        # (CO8, 1)
    mean = s / M
    var = jnp.maximum(sq / M - mean * mean, 0.0)
    inv_std = jax.lax.rsqrt(var + EPS)
    gamma8 = jnp.zeros((CO8, 1), jnp.float32).at[:Cout, 0].set(gamma.astype(jnp.float32))
    beta8 = jnp.zeros((CO8, 1), jnp.float32).at[:Cout, 0].set(beta.astype(jnp.float32))
    scale = gamma8 * inv_std                                    # (CO8, 1)
    shift = beta8 - mean * scale                                # (CO8, 1)

    # ---- pass 2: elementwise folded BN + ReLU, in place over the conv stash ----
    n_tiles = M_pad // tile_m
    out_t = pl.pallas_call(
        _bn_relu_kernel,
        out_shape=jax.ShapeDtypeStruct((CO8, M_pad), jnp.float32),
        grid=(n_tiles,),
        in_specs=[pl.BlockSpec((CO8, tile_m), lambda i: (0, i)),
                  pl.BlockSpec((CO8, 1), lambda i: (0, 0)),
                  pl.BlockSpec((CO8, 1), lambda i: (0, 0))],
        out_specs=pl.BlockSpec((CO8, tile_m), lambda i: (0, i)),
        input_output_aliases={0: 0},            # reuse the conv-stash HBM buffer
        compiler_params=pltpu.CompilerParams(
            dimension_semantics=("parallel",),
            vmem_limit_bytes=vmem_limit),
    )(conv_stash, scale, shift)

    # (Cout, N*Ho*Wo) -> NCHW.  The remaining XLA transpose only moves whole
    # contiguous Ho*Wo planes (free for N == 1); a per-image output grid could
    # remove it entirely but is not worth the extra plumbing here.
    out = out_t[:Cout, :M].reshape(Cout, N, Ho, Wo).transpose(1, 0, 2, 3)
    return out


def _reference(x_nchw, conv_w, gamma, beta):
    """Pure-JAX reference with the same MXU precision (bf16 inputs, f32 accumulate)."""
    conv = jax.lax.conv_general_dilated(
        x_nchw.astype(jnp.bfloat16), conv_w.astype(jnp.bfloat16),
        window_strides=(STRIDE, STRIDE), padding=((PAD, PAD), (PAD, PAD)),
        dimension_numbers=("NCHW", "OIHW", "NCHW"),
        preferred_element_type=jnp.float32)
    mean = jnp.mean(conv, axis=(0, 2, 3), keepdims=True)
    var = jnp.mean((conv - mean) ** 2, axis=(0, 2, 3), keepdims=True)
    y = (conv - mean) * jax.lax.rsqrt(var + EPS)
    y = y * gamma.reshape(1, -1, 1, 1) + beta.reshape(1, -1, 1, 1)
    return jnp.maximum(y, 0.0)


if __name__ == "__main__":
    # Gate(in_channels=4, blocks_sizes=[32, ...]) at a small spatial size.
    N, Cin, H, W = 2, 4, 32, 32
    Cout = 32

    key = jax.random.PRNGKey(0)
    kx, kw = jax.random.split(key)
    x = jax.random.normal(kx, (N, Cin, H, W), dtype=jnp.float32)
    conv_w = jax.random.normal(kw, (Cout, Cin, K_SIZE, K_SIZE), dtype=jnp.float32) * 0.05
    gamma = jnp.ones((Cout,), dtype=jnp.float32)   # BatchNorm weight init
    beta = jnp.zeros((Cout,), dtype=jnp.float32)   # BatchNorm bias init

    # tile_m=128 -> grid (2 cores, 2 tiles/core): exercises per-core multi-tile
    # accumulation AND the cross-core stats combine even at this toy size.
    fwd = jax.jit(functools.partial(gate_forward, tile_m=128))
    out = jax.block_until_ready(fwd(x, conv_w, gamma, beta))
    ref = jax.block_until_ready(_reference(x, conv_w, gamma, beta))

    assert out.shape == (N, Cout, H // 2, W // 2), out.shape
    max_err = float(jnp.max(jnp.abs(out - ref)))
    assert max_err < 5e-4, max_err

    print("KERNEL_OK")
</pallas_src>

<mosaic_0001>
module attributes {stable_mosaic.version = 11 : i64} {
  func.func @_conv_stats_kernel(%arg0: i32, %arg1: i32, %arg2: memref<32x196xbf16, #tpu.memory_space<vmem>>, %arg3: memref<196x128xbf16, #tpu.memory_space<vmem>>, %arg4: memref<32x128xf32, #tpu.memory_space<vmem>>, %arg5: memref<32x1xf32, #tpu.memory_space<vmem>>, %arg6: memref<32x1xf32, #tpu.memory_space<vmem>>) attributes {dimension_semantics = [#tpu.dimension_semantics<parallel>, #tpu.dimension_semantics<arbitrary>], iteration_bounds = array<i64: 2, 2>, scalar_prefetch = 0 : i64, scratch_operands = 0 : i64, tpu.core_type = #tpu.core_type<tc>, window_params = [{pipeline_mode = #tpu.pipeline_mode<synchronous>, transform_indices = @transform_0, window_bounds = array<i64: 32, 196>}, {transform_indices = @transform_1, window_bounds = array<i64: 196, 128>}, {transform_indices = @transform_2, window_bounds = array<i64: 32, 128>}, {transform_indices = @transform_3, window_bounds = array<i64: 32, 1>}, {transform_indices = @transform_4, window_bounds = array<i64: 32, 1>}]} {
    %c0_i32 = arith.constant 0 : i32
    %0 = arith.cmpi eq, %arg1, %c0_i32 : i32
    %1 = arith.extui %0 : i1 to i32
    %c0_i32_0 = arith.constant 0 : i32
    %2 = arith.cmpi ne, %1, %c0_i32_0 : i32
    scf.if %2 {
      %cst_16 = arith.constant 0.000000e+00 : f32
      %18 = vector.broadcast %cst_16 : f32 to vector<32x1xf32>
      %c0_17 = arith.constant 0 : index
      %c0_18 = arith.constant 0 : index
      %19 = vector.load %arg5[%c0_17, %c0_18] : memref<32x1xf32, #tpu.memory_space<vmem>>, vector<32x1xf32>
      tpu.vector_store %arg5[%c0_17, %c0_18], %18 {strides = array<i32>} : memref<32x1xf32, #tpu.memory_space<vmem>>, vector<32x1xf32>,
      %cst_19 = arith.constant 0.000000e+00 : f32
      %20 = vector.broadcast %cst_19 : f32 to vector<32x1xf32>
      %c0_20 = arith.constant 0 : index
      %c0_21 = arith.constant 0 : index
      %21 = vector.load %arg6[%c0_20, %c0_21] : memref<32x1xf32, #tpu.memory_space<vmem>>, vector<32x1xf32>
      tpu.vector_store %arg6[%c0_20, %c0_21], %20 {strides = array<i32>} : memref<32x1xf32, #tpu.memory_space<vmem>>, vector<32x1xf32>,
    } else {
    }
    %c0 = arith.constant 0 : index
    %c0_1 = arith.constant 0 : index
    %3 = vector.load %arg2[%c0, %c0_1] : memref<32x196xbf16, #tpu.memory_space<vmem>>, vector<32x196xbf16>
    %c0_2 = arith.constant 0 : index
    %c0_3 = arith.constant 0 : index
    %4 = vector.load %arg3[%c0_2, %c0_3] : memref<196x128xbf16, #tpu.memory_space<vmem>>, vector<196x128xbf16>
    %cst = arith.constant dense<0.000000e+00> : vector<32x128xf32>
    %5 = tpu.matmul %3, %4, %cst {dimension_numbers = #tpu.dot_dimension_numbers<[1], [0], [0], [1], [0, 0, 1, 1], [], []>} : vector<32x196xbf16>, vector<196x128xbf16>, vector<32x128xf32> -> vector<32x128xf32>
    %c0_4 = arith.constant 0 : index
    %c0_5 = arith.constant 0 : index
    %6 = vector.load %arg4[%c0_4, %c0_5] : memref<32x128xf32, #tpu.memory_space<vmem>>, vector<32x128xf32>
    tpu.vector_store %arg4[%c0_4, %c0_5], %5 {strides = array<i32>} : memref<32x128xf32, #tpu.memory_space<vmem>>, vector<32x128xf32>,
    %c0_6 = arith.constant 0 : index
    %c0_7 = arith.constant 0 : index
    %7 = vector.load %arg5[%c0_6, %c0_7] : memref<32x1xf32, #tpu.memory_space<vmem>>, vector<32x1xf32>
    %cst_8 = arith.constant dense<0.000000e+00> : vector<32xf32>
    %8 = vector.multi_reduction <add>, %5, %cst_8 [1] : vector<32x128xf32> to vector<32xf32>
    %9 = vector.shape_cast %8 : vector<32xf32> to vector<32x1xf32>
    %10 = arith.addf %7, %9 : vector<32x1xf32>
    %c0_9 = arith.constant 0 : index
    %c0_10 = arith.constant 0 : index
    %11 = vector.load %arg5[%c0_9, %c0_10] : memref<32x1xf32, #tpu.memory_space<vmem>>, vector<32x1xf32>
    tpu.vector_store %arg5[%c0_9, %c0_10], %10 {strides = array<i32>} : memref<32x1xf32, #tpu.memory_space<vmem>>, vector<32x1xf32>,
    %c0_11 = arith.constant 0 : index
    %c0_12 = arith.constant 0 : index
    %12 = vector.load %arg6[%c0_11, %c0_12] : memref<32x1xf32, #tpu.memory_space<vmem>>, vector<32x1xf32>
    %13 = arith.mulf %5, %5 : vector<32x128xf32>
    %cst_13 = arith.constant dense<0.000000e+00> : vector<32xf32>
    %14 = vector.multi_reduction <add>, %13, %cst_13 [1] : vector<32x128xf32> to vector<32xf32>
    %15 = vector.shape_cast %14 : vector<32xf32> to vector<32x1xf32>
    %16 = arith.addf %12, %15 : vector<32x1xf32>
    %c0_14 = arith.constant 0 : index
    %c0_15 = arith.constant 0 : index
    %17 = vector.load %arg6[%c0_14, %c0_15] : memref<32x1xf32, #tpu.memory_space<vmem>>, vector<32x1xf32>
    tpu.vector_store %arg6[%c0_14, %c0_15], %16 {strides = array<i32>} : memref<32x1xf32, #tpu.memory_space<vmem>>, vector<32x1xf32>,
    return
  }
  func.func @transform_0(%arg0: i32, %arg1: i32) -> (i32, i32) {
    %c0_i32 = arith.constant 0 : i32
    %c0_i32_0 = arith.constant 0 : i32
    %c0_i32_1 = arith.constant 0 : i32
    return %c0_i32, %c0_i32_0 : i32, i32
  }
  func.func @transform_1(%arg0: i32, %arg1: i32) -> (i32, i32) {
    %c2_i32 = arith.constant 2 : i32
    %0 = arith.muli %arg0, %c2_i32 : i32
    %1 = arith.addi %0, %arg1 : i32
    %c0_i32 = arith.constant 0 : i32
    %c0_i32_0 = arith.constant 0 : i32
    return %c0_i32, %1 : i32, i32
  }
  func.func @transform_2(%arg0: i32, %arg1: i32) -> (i32, i32) {
    %c2_i32 = arith.constant 2 : i32
    %0 = arith.muli %arg0, %c2_i32 : i32
    %1 = arith.addi %0, %arg1 : i32
    %c0_i32 = arith.constant 0 : i32
    %c0_i32_0 = arith.constant 0 : i32
    return %c0_i32, %1 : i32, i32
  }
  func.func @transform_3(%arg0: i32, %arg1: i32) -> (i32, i32) {
    %c0_i32 = arith.constant 0 : i32
    %c0_i32_0 = arith.constant 0 : i32
    return %arg0, %c0_i32 : i32, i32
  }
  func.func @transform_4(%arg0: i32, %arg1: i32) -> (i32, i32) {
    %c0_i32 = arith.constant 0 : i32
    %c0_i32_0 = arith.constant 0 : i32
    return %arg0, %c0_i32 : i32, i32
  }
}

module attributes {stable_mosaic.version = 11 : i64} {
  func.func @_bn_relu_kernel(%arg0: i32, %arg1: memref<32x128xf32, #tpu.memory_space<vmem>>, %arg2: memref<32x1xf32, #tpu.memory_space<vmem>>, %arg3: memref<32x1xf32, #tpu.memory_space<vmem>>, %arg4: memref<32x128xf32, #tpu.memory_space<vmem>>) attributes {dimension_semantics = [#tpu.dimension_semantics<parallel>], iteration_bounds = array<i64: 4>, scalar_prefetch = 0 : i64, scratch_operands = 0 : i64, tpu.core_type = #tpu.core_type<tc>, window_params = [{transform_indices = @transform_0, window_bounds = array<i64: 32, 128>}, {pipeline_mode = #tpu.pipeline_mode<synchronous>, transform_indices = @transform_1, window_bounds = array<i64: 32, 1>}, {pipeline_mode = #tpu.pipeline_mode<synchronous>, transform_indices = @transform_2, window_bounds = array<i64: 32, 1>}, {transform_indices = @transform_3, window_bounds = array<i64: 32, 128>}]} {
    %c0 = arith.constant 0 : index
    %c0_0 = arith.constant 0 : index
    %0 = vector.load %arg1[%c0, %c0_0] : memref<32x128xf32, #tpu.memory_space<vmem>>, vector<32x128xf32>
    %c0_1 = arith.constant 0 : index
    %c0_2 = arith.constant 0 : index
    %1 = vector.load %arg2[%c0_1, %c0_2] : memref<32x1xf32, #tpu.memory_space<vmem>>, vector<32x1xf32>
    %2 = vector.broadcast %1 : vector<32x1xf32> to vector<32x128xf32>
    %3 = arith.mulf %0, %2 : vector<32x128xf32>
    %c0_3 = arith.constant 0 : index
    %c0_4 = arith.constant 0 : index
    %4 = vector.load %arg3[%c0_3, %c0_4] : memref<32x1xf32, #tpu.memory_space<vmem>>, vector<32x1xf32>
    %5 = vector.broadcast %4 : vector<32x1xf32> to vector<32x128xf32>
    %6 = arith.addf %3, %5 : vector<32x128xf32>
    %cst = arith.constant 0.000000e+00 : f32
    %7 = vector.broadcast %cst : f32 to vector<32x128xf32>
    %8 = arith.maximumf %6, %7 : vector<32x128xf32>
    %c0_5 = arith.constant 0 : index
    %c0_6 = arith.constant 0 : index
    %9 = vector.load %arg4[%c0_5, %c0_6] : memref<32x128xf32, #tpu.memory_space<vmem>>, vector<32x128xf32>
    tpu.vector_store %arg4[%c0_5, %c0_6], %8 {strides = array<i32>} : memref<32x128xf32, #tpu.memory_space<vmem>>, vector<32x128xf32>,
    return
  }
  func.func @transform_0(%arg0: i32) -> (i32, i32) {
    %c0_i32 = arith.constant 0 : i32
    %c0_i32_0 = arith.constant 0 : i32
    return %c0_i32, %arg0 : i32, i32
  }
  func.func @transform_1(%arg0: i32) -> (i32, i32) {
    %c0_i32 = arith.constant 0 : i32
    %c0_i32_0 = arith.constant 0 : i32
    %c0_i32_1 = arith.constant 0 : i32
    return %c0_i32, %c0_i32_0 : i32, i32
  }
  func.func @transform_2(%arg0: i32) -> (i32, i32) {
    %c0_i32 = arith.constant 0 : i32
    %c0_i32_0 = arith.constant 0 : i32
    %c0_i32_1 = arith.constant 0 : i32
    return %c0_i32, %c0_i32_0 : i32, i32
  }
  func.func @transform_3(%arg0: i32) -> (i32, i32) {
    %c0_i32 = arith.constant 0 : i32
    %c0_i32_0 = arith.constant 0 : i32
    return %c0_i32, %arg0 : i32, i32
  }
}

</mosaic_0001>

<bundles_post_ra>
// kernel: gate_forward.3
= control target key start
LH: loop header
LB: loop body
LE: loop exit
PB: predicated region body
PF: predicated region fallthrough
CT: control target
= control target key end

     0   :  { %s475_s12 = smov 0   ;;  %s477_s13 = smov 0   ;;  %s559_s0 = inlined_call_operand.vmem [shape: f32[32,512], index: 0, kind: input, shape index: {}, may-alias: {0,3}]   ;;  %s560_s1 = inlined_call_operand.vmem [shape: f32[32,1], index: 1, kind: input, shape index: {}]   ;;  %s561_s2 = inlined_call_operand.vmem [shape: f32[32,1], index: 2, kind: input, shape index: {}]   ;;  %s562_s3 = inlined_call_operand.vmem [shape: f32[32,512], index: 3, kind: output, shape index: {}, may-alias: {0,3}]  }
   0x1   :  { %s479_s14 = smov 0  }
   0x2 LB: > { %s390_s15 = sadd.s32 4294967295, %s452_s14   ;;  %s492_s16 = sadd.s32 1, %s452_s14   ;;  %s452_s14 = sphi %s479_s14, %s566_s14   ;;  %s448_s13 = sphi %s477_s13, %s565_s13   ;;  %s444_s12 = sphi %s475_s12, %s564_s12  }
   0x3   : > { %s17_s17 = ssub.s32 %s452_s14, %s492_s16  ;;  %s20_s18 = sadd.s32 1, %s448_s13 }
   0x4   : > { %p18_p0 = scmp.eq.s32.totalorder %s17_s17, 0  ;;  %p27_p1 = scmp.ne.s32.totalorder %s448_s13, %s444_s12 }
   0x5   : > { %p28_p2 = scmp.eq.s32.totalorder %s452_s14, 0  ;;  %p99_p3 = scmp.eq.s32.totalorder %s390_s15, 3 }
   0x6   : > { %s503_s19 = scalar_select %p18_p0, %s448_s13, %s20_s18  }
   0x7   : > { %p29_p4 = por %p28_p2, %p27_p1  ;;  %p505_p5 = por %p99_p3, %p27_p1 }
   0x8   : > { %p393_p6 = scmp.ge.s32.totalorder %s452_s14, 4 }
   0xa   : > { %127 = sbr.rel (%p393_p6) target bundleno = 23 (0x17), region = 24 }
   0xf   : > { %130 = sbr.rel (!%p29_p4) target bundleno = 23 (0x17), region = 28  ;;  %s132_s21 = sand.u32 (%p29_p4), 1, %s448_s13  }
  0x10   : > { %s395_s22 = sshll.u32 (%p29_p4), %s452_s14, 3  ;;  %s394_s23 = sshll.u32 (%p29_p4), %s132_s21, 5 }
  0x11   : > { %s136_s26 = scalar_lea.vmem (%p29_p4), %s559_s0, %s395_s22  ;;  %s134_s27 = scalar_lea.vmem (%p29_p4), [#allocation2], %s394_s23 }
  0x12   : > { %v171_v0 = vld [vmem:[%s136_s26] sm:$0xff] (%p29_p4) }
  0x13   : > { %v173_v1 = vld [vmem:[%s136_s26 + $0x20] sm:$0xff] (%p29_p4)  ;;  %172 = vst [vmem:[%s134_s27] sm:$0xff] (%p29_p4), %v171_v0 }
  0x14   : > { %v175_v2 = vld [vmem:[%s136_s26 + $0x40] sm:$0xff]  ;;  %174 = vst [vmem:[%s134_s27 + $0x8] sm:$0xff] %v173_v1 }
  0x15   : > { %176 = vst [vmem:[%s134_s27 + $0x10] sm:$0xff] %v175_v2  ;;  %v177_v3 = vld [vmem:[%s136_s26 + $0x60] sm:$0xff] }
  0x16   : > { %178 = vst [vmem:[%s134_s27 + $0x18] sm:$0xff] %v177_v3 }
  0x17 PF: > { %p396_p7 = scmp.ge.s32.totalorder %s452_s14, 1  ;;  %p183_p8 = scmp.lt.s32.totalorder %s452_s14, 5 }
  0x19   : > { %p184_p9 = pnand %p396_p7, %p183_p8 }
  0x1a   : > { %s190_s24 = sand.u32 (!%p184_p9), 1, %s444_s12  }
  0x1b   : > { %187 = sbr.rel (%p184_p9) target bundleno = 183 (0xb7), region = 66  ;;  %s397_s25 = sshll.u32 (!%p184_p9), %s190_s24, 5 }
  0x1c   : > { %s192_s26 = scalar_lea.vmem (!%p184_p9), [#allocation2], %s397_s25  ;;  %s211_s12 = scalar_lea.vmem (!%p184_p9), [#allocation3], %s397_s25 }
  0x20   : > { %v218_v4 = vld [vmem:[%s560_s1 + $0x10] sm:$0xff]  ;;  %v216_v5 = vld [vmem:[%s560_s1] sm:$0xff]  ;;  %v454_v6 = vmov 0   ;;  %v219_v7 = vld [vmem:[%s560_s1 + $0x18] sm:$0xff]  ;;  %s400_s27 = sshll.u32 (%p505_p5), %s390_s15, 3 }
  0x21   : > { %429 = vset.pattern.permute.xlu1 %v454_v6  ;;  %428 = vset.pattern.permute.xlu0 %v454_v6  ;;  %v217_v8 = vld [vmem:[%s560_s1 + $0x8] sm:$0xff]  ;;  %v244_v10 = vld [vmem:[%s561_s2] sm:$0xff]  ;;  %v247_v11 = vld [vmem:[%s561_s2 + $0x18] sm:$0xff]  ;;  %s288_s30 = scalar_lea.vmem (%p505_p5), %s562_s3, %s400_s27 }
  0x22   : > { %232 = vperm.xlu1 %429, %v218_v4   ;;  %222 = vperm.xlu0 %428, %v216_v5   ;;  %v245_v9 = vld [vmem:[%s561_s2 + $0x8] sm:$0xff]  ;;  %v246_v12 = vld [vmem:[%s561_s2 + $0x10] sm:$0xff]  ;;  %v212_v15 = vld [vmem:[%s192_s26] sm:$0xff] }
  0x23   : > { %v213_v18 = vld [vmem:[%s192_s26 + $0x8] sm:$0xff]  ;;  %v214_v21 = vld [vmem:[%s192_s26 + $0x10] sm:$0xff]  ;;  %v215_v22 = vld [vmem:[%s192_s26 + $0x18] sm:$0xff] }
  0x26   : > { %237 = vperm.xlu1 %429, %v219_v7   ;;  %227 = vperm.xlu0 %428, %v217_v8  }
  0x2a   : > { %255 = vperm.xlu1 %429, %v245_v9   ;;  %250 = vperm.xlu0 %428, %v244_v10  }
  0x2e   : > { %265 = vperm.xlu1 %429, %v247_v11   ;;  %260 = vperm.xlu0 %428, %v246_v12  }
  0x9d   : > { %v233_v13 = vpop.permute.xlu1 %232  ;;  %v223_v14 = vpop.permute.xlu0 %222 }
  0x9e   : > { %v240_v19 = vmul.f32 %v223_v14, %v212_v15  ;;  %v242_v27 = vmul.f32 %v233_v13, %v214_v21 }
  0xa1   : > { %v238_v16 = vpop.permute.xlu1 %237  ;;  %v228_v17 = vpop.permute.xlu0 %227 }
  0xa2   : > { %v241_v20 = vmul.f32 %v228_v17, %v213_v18  ;;  %v243_v28 = vmul.f32 %v238_v16, %v215_v22 }
  0xa5   : > { %v256_v23 = vpop.permute.xlu1 %255  ;;  %v251_v24 = vpop.permute.xlu0 %250 }
  0xa6   : > { %v269_v25 = vadd.f32 %v256_v23, %v241_v20  ;;  %v268_v26 = vadd.f32 %v251_v24, %v240_v19 }
  0xa8   : > { %v273_v29 = vmax.f32 %v269_v25, 0.0  ;;  %v272_v30 = vmax.f32 %v268_v26, 0.0 }
  0xa9   : > { %v266_v31 = vpop.permute.xlu1 %265  ;;  %v261_v32 = vpop.permute.xlu0 %260 }
  0xaa   : > { %277 = vst [vmem:[%s211_s12 + $0x8] sm:$0xff] %v273_v29  ;;  %276 = vst [vmem:[%s211_s12] sm:$0xff] %v272_v30  ;;  %v271_v33 = vadd.f32 %v266_v31, %v243_v28  ;;  %v270_v34 = vadd.f32 %v261_v32, %v242_v27  ;;  %286 = sbr.rel (!%p505_p5) target bundleno = 183 (0xb7), region = 74 }
  0xac   : > { %v275_v35 = vmax.f32 %v271_v33, 0.0  ;;  %v274_v36 = vmax.f32 %v270_v34, 0.0 }
  0xae   : > { %279 = vst [vmem:[%s211_s12 + $0x18] sm:$0xff] %v275_v35  ;;  %278 = vst [vmem:[%s211_s12 + $0x10] sm:$0xff] %v274_v36 }
  0xb1   : > { %v323_v37 = vld [vmem:[%s211_s12] sm:$0xff]  ;;  %v325_v38 = vld [vmem:[%s211_s12 + $0x8] sm:$0xff] }
  0xb2   : > { %324 = vst [vmem:[%s288_s30] sm:$0xff] %v323_v37  ;;  %326 = vst [vmem:[%s288_s30 + $0x20] sm:$0xff] %v325_v38 }
  0xb5   : > { %v327_v39 = vld [vmem:[%s211_s12 + $0x10] sm:$0xff]  ;;  %v329_v40 = vld [vmem:[%s211_s12 + $0x18] sm:$0xff] }
  0xb6   : > { %328 = vst [vmem:[%s288_s30 + $0x40] sm:$0xff] %v327_v39  ;;  %330 = vst [vmem:[%s288_s30 + $0x60] sm:$0xff] %v329_v40 }
  0xb7 PF: > { %p10_p10 = scmp.ge.s32.totalorder %s492_s16, 6   ;;  %s564_s12 = smov %s448_s13 }
  0xb8   : > { %s565_s13 = smov %s503_s19  ;;  %s566_s14 = smov %s492_s16 }
  0xb9   :  { %12 = sbr.rel (!%p10_p10) target bundleno = 2 (0x2), region = 143 }

// kernel: gate_forward.2
= control target key start
LH: loop header
LB: loop body
LE: loop exit
PB: predicated region body
PF: predicated region fallthrough
CT: control target
= control target key end

     0   :  { %s1054_s15 = smov 0   ;;  %s1056_s16 = smov 0   ;;  %s1309_s0 = inlined_call_operand.vmem [shape: bf16[32,196], index: 0, kind: input, shape index: {}]   ;;  %s1310_s1 = inlined_call_operand.vmem [shape: bf16[196,512], index: 1, kind: input, shape index: {}]   ;;  %s1311_s2 = inlined_call_operand.vmem [shape: f32[32,512], index: 2, kind: output, shape index: {0}]   ;;  %s1312_s3 = inlined_call_operand.vmem [shape: f32[64,1], index: 3, kind: output, shape index: {1}]   ;;  %s1313_s4 = inlined_call_operand.vmem [shape: f32[64,1], index: 4, kind: output, shape index: {2}]  }
   0x1   :  { %s1058_s17 = smov 0   ;;  %s1060_s18 = smov 0  }
   0x2   :  { %s1062_s19 = smov 0   ;;  %s1064_s20 = smov 0  }
   0x3   :  { %s1066_s21 = smov 0  }
   0x4 LB: > { %s24_s22 = sadd.s32 1, %s1017_s19  ;;  %s27_s23 = sadd.s32 1, %s1021_s20  ;;  %s1025_s21 = sphi %s1066_s21, %s15_s21   ;;  %s1021_s20 = sphi %s1064_s20, %s1320_s20   ;;  %s1017_s19 = sphi %s1062_s19, %s1319_s19   ;;  %s1013_s18 = sphi %s1060_s18, %s1318_s18   ;;  %s1009_s17 = sphi %s1058_s17, %s1317_s17   ;;  %s1005_s16 = sphi %s1056_s16, %s1316_s16   ;;  %s1001_s15 = sphi %s1054_s15, %s1315_s15  }
   0x5   : > { %p25_p0 = scmp.ge.s32.totalorder %s24_s22, 2  ;;  %s825_s24 = sadd.s32 4294967295, %s1025_s21  }
   0x6   : > { %s827_s25 = sshll.u32 %s1021_s20, 1  ;;  %p66_p1 = scmp.ne.s32.totalorder %s1005_s16, %s1001_s15 }
   0x7   : > { %s1322_s22 = smov (%p25_p0, %s24_s22), 0  ;;  %s1324_s23 = smov (!%p25_p0, %s27_s23), %s1021_s20 }
   0x8   : > { %p29_p2 = scmp.ge.s32.totalorder %s1324_s23, 2  ;;  %p67_p3 = scmp.eq.s32.totalorder %s1025_s21, 0 }
   0x9   : > { %s53_s26 = sadd.s32 %s1017_s19, %s827_s25  ;;  %p100_p4 = scmp.eq.s32.totalorder %s825_s24, 3 }
   0xa   : > { %s1326_s23 = smov (%p29_p2, %s1324_s23), 0  ;;  %p68_p5 = por %p67_p3, %p66_p1 }
   0xb   : > { %p1102_p6 = por %p100_p4, %p66_p1  ;;  %s828_s28 = sshll.u32 %s1326_s23, 1 }
   0xc   : > { %s55_s29 = sadd.s32 %s828_s28, %s1322_s22  ;;  %s59_s5 = sadd.s32 1, %s1005_s16 }
   0xd   : > { %s56_s30 = ssub.s32 %s53_s26, %s55_s29  ;;  %p832_p8 = scmp.ge.s32.totalorder %s1025_s21, 4 }
   0xe   : > { %p57_p7 = scmp.eq.s32.totalorder %s56_s30, 0 }
   0xf   : > { %177 = sbr.rel (%p832_p8) target bundleno = 41 (0x29), region = 20 }
  0x10   : > { %s1110_s6 = scalar_select %p57_p7, %s1005_s16, %s59_s5  }
  0x14   : > { %180 = sbr.rel (!%p68_p5) target bundleno = 41 (0x29), region = 24  ;;  %s182_s7 = sand.u32 (%p68_p5), 1, %s1005_s16  }
  0x15   : > { %s834_s8 = sshll.u32 (%p68_p5), %s53_s26, 2  ;;  %s892_s9 = smul.u32 (%p68_p5), 100, %s182_s7 }
  0x16   : > { %s1117_s12 = scalar_lea.vmem (%p68_p5), %s1310_s1, %s834_s8 }
  0x17   : > { %v205_v0 = vld [vmem:[%s1117_s12] sm:$0xf] (%p68_p5)  ;;  %v207_v1 = vld [vmem:[%s1117_s12 + $0x10] sm:$0xf] (%p68_p5)  ;;  %s1124_s13 = scalar_lea.vmem (%p68_p5), [#allocation2], %s892_s9 }
  0x18   : > { %v209_v2 = vld [vmem:[%s1117_s12 + $0x20] sm:$0xf] (%p68_p5)  ;;  %v211_v3 = vld [vmem:[%s1117_s12 + $0x30] sm:$0xf] (%p68_p5)  ;;  %206 = vst [vmem:[%s1124_s13] sm:$0xf] (%p68_p5), %v205_v0 }
  0x19   : > { %v213_v4 = vld [vmem:[%s1117_s12 + $0x40] sm:$0xf]  ;;  %208 = vst [vmem:[%s1124_s13 + $0x4] sm:$0xf] %v207_v1  ;;  %210 = vst [vmem:[%s1124_s13 + $0x8] sm:$0xf] %v209_v2 }
  0x1a   : > { %212 = vst [vmem:[%s1124_s13 + $0xc] sm:$0xf] %v211_v3  ;;  %214 = vst [vmem:[%s1124_s13 + $0x10] sm:$0xf] %v213_v4  ;;  %v215_v5 = vld [vmem:[%s1117_s12 + $0x50] sm:$0xf] }
  0x1b   : > { %v217_v6 = vld [vmem:[%s1117_s12 + $0x60] sm:$0xf]  ;;  %v219_v7 = vld [vmem:[%s1117_s12 + $0x70] sm:$0xf]  ;;  %216 = vst [vmem:[%s1124_s13 + $0x14] sm:$0xf] %v215_v5 }
  0x1c   : > { %218 = vst [vmem:[%s1124_s13 + $0x18] sm:$0xf] %v217_v6  ;;  %220 = vst [vmem:[%s1124_s13 + $0x1c] sm:$0xf] %v219_v7  ;;  %v221_v8 = vld [vmem:[%s1117_s12 + $0x80] sm:$0xf] }
  0x1d   : > { %v223_v9 = vld [vmem:[%s1117_s12 + $0x90] sm:$0xf]  ;;  %v225_v10 = vld [vmem:[%s1117_s12 + $0xa0] sm:$0xf]  ;;  %222 = vst [vmem:[%s1124_s13 + $0x20] sm:$0xf] %v221_v8 }
  0x1e   : > { %224 = vst [vmem:[%s1124_s13 + $0x24] sm:$0xf] %v223_v9  ;;  %226 = vst [vmem:[%s1124_s13 + $0x28] sm:$0xf] %v225_v10  ;;  %v227_v11 = vld [vmem:[%s1117_s12 + $0xb0] sm:$0xf] }
  0x1f   : > { %v229_v12 = vld [vmem:[%s1117_s12 + $0xc0] sm:$0xf]  ;;  %v231_v13 = vld [vmem:[%s1117_s12 + $0xd0] sm:$0xf]  ;;  %228 = vst [vmem:[%s1124_s13 + $0x2c] sm:$0xf] %v227_v11 }
  0x20   : > { %230 = vst [vmem:[%s1124_s13 + $0x30] sm:$0xf] %v229_v12  ;;  %232 = vst [vmem:[%s1124_s13 + $0x34] sm:$0xf] %v231_v13  ;;  %v233_v14 = vld [vmem:[%s1117_s12 + $0xe0] sm:$0xf] }
  0x21   : > { %v235_v15 = vld [vmem:[%s1117_s12 + $0xf0] sm:$0xf]  ;;  %v237_v16 = vld [vmem:[%s1117_s12 + $0x100] sm:$0xf]  ;;  %234 = vst [vmem:[%s1124_s13 + $0x38] sm:$0xf] %v233_v14 }
  0x22   : > { %236 = vst [vmem:[%s1124_s13 + $0x3c] sm:$0xf] %v235_v15  ;;  %238 = vst [vmem:[%s1124_s13 + $0x40] sm:$0xf] %v237_v16  ;;  %v239_v17 = vld [vmem:[%s1117_s12 + $0x110] sm:$0xf] }
  0x23   : > { %v241_v18 = vld [vmem:[%s1117_s12 + $0x120] sm:$0xf]  ;;  %v243_v19 = vld [vmem:[%s1117_s12 + $0x130] sm:$0xf]  ;;  %240 = vst [vmem:[%s1124_s13 + $0x44] sm:$0xf] %v239_v17 }
  0x24   : > { %242 = vst [vmem:[%s1124_s13 + $0x48] sm:$0xf] %v241_v18  ;;  %244 = vst [vmem:[%s1124_s13 + $0x4c] sm:$0xf] %v243_v19  ;;  %v245_v20 = vld [vmem:[%s1117_s12 + $0x140] sm:$0xf] }
  0x25   : > { %v247_v21 = vld [vmem:[%s1117_s12 + $0x150] sm:$0xf]  ;;  %v249_v22 = vld [vmem:[%s1117_s12 + $0x160] sm:$0xf]  ;;  %246 = vst [vmem:[%s1124_s13 + $0x50] sm:$0xf] %v245_v20 }
  0x26   : > { %248 = vst [vmem:[%s1124_s13 + $0x54] sm:$0xf] %v247_v21  ;;  %250 = vst [vmem:[%s1124_s13 + $0x58] sm:$0xf] %v249_v22  ;;  %v251_v23 = vld [vmem:[%s1117_s12 + $0x170] sm:$0xf] }
  0x27   : > { %v253_v24 = vld [vmem:[%s1117_s12 + $0x180] sm:$0xf]  ;;  %252 = vst [vmem:[%s1124_s13 + $0x5c] sm:$0xf] %v251_v23 }
  0x28   : > { %254 = vst [vmem:[%s1124_s13 + $0x60] sm:$0xf] %v253_v24 }
  0x29 PF: > { %p835_p9 = scmp.ge.s32.totalorder %s1025_s21, 1  ;;  %p327_p10 = scmp.lt.s32.totalorder %s1025_s21, 5 }
  0x2b   : > { %p328_p11 = pnand %p835_p9, %p327_p10 }
  0x2c   : > { %s334_s14 = sand.u32 (!%p328_p11), 1, %s1001_s15   ;;  %s837_s24 = sshll.u32 (!%p328_p11), %s1013_s18, 2 }
  0x2d   : > { %331 = sbr.rel (%p328_p11) target bundleno = 463 (0x1cf), region = 65  ;;  %s836_s26 = sshll.u32 (!%p328_p11), %s334_s14, 5 }
  0x2e   : > { %s893_s25 = smul.u32 (!%p328_p11), 100, %s334_s14  ;;  %p373_p12 = scmp.lt.s32.totalorder (!%p328_p11), %s837_s24, 7 }
  0x2f   : > { %s1187_s11 = scalar_lea.vmem (!%p328_p11), [#allocation3], %s836_s26  ;;  %p841_p13 = scmp.ne.s32.totalorder (!%p328_p11), %s1009_s17, 0 }
  0x30   : > { %s1185_s10 = scalar_lea.vmem (!%p328_p11), [#allocation2], %s893_s25 }
  0x32   : > { %s1328_s24 = smov (!%p373_p12, %s837_s24), 7  ;;  %388 = sbr.rel (%p841_p13) target bundleno = 60 (0x3c), region = 73 }
  0x33   : > { %s838_s28 = sshll.u32 %s1328_s24, 3 }
  0x34   : > { %s1178_s5 = scalar_lea.vmem %s1312_s3, %s838_s28  ;;  %s1183_s9 = scalar_lea.vmem %s1313_s4, %s838_s28 }
  0x37   : > { %vm389_vm0 = vcmask 7168   ;;  %v1027_v25 = vmov 0.0  }
  0x38   : > { %390 = vst.msk [vmem:[%s1178_s5] sm:$0xff] %vm389_vm0, %v1027_v25  ;;  %394 = vst.msk [vmem:[%s1183_s9] sm:$0xff] %vm389_vm0, %v1027_v25 }
  0x39   : > { %391 = vst.msk [vmem:[%s1178_s5 + $0x8] sm:$0xff] %vm389_vm0, %v1027_v25  ;;  %395 = vst.msk [vmem:[%s1183_s9 + $0x8] sm:$0xff] %vm389_vm0, %v1027_v25 }
  0x3a   : > { %392 = vst.msk [vmem:[%s1178_s5 + $0x10] sm:$0xff] %vm389_vm0, %v1027_v25  ;;  %396 = vst.msk [vmem:[%s1183_s9 + $0x10] sm:$0xff] %vm389_vm0, %v1027_v25 }
  0x3b   : > { %393 = vst.msk [vmem:[%s1178_s5 + $0x18] sm:$0xff] %vm389_vm0, %v1027_v25  ;;  %397 = vst.msk [vmem:[%s1183_s9 + $0x18] sm:$0xff] %vm389_vm0, %v1027_v25 }
  0x3c PF: > { %v952_v26 = vld [vmem:[%s1185_s10 + $0x38] sm:$0xff]   ;;  %v1028_v27 = vmov 0   ;;  %v953_v28 = vld [vmem:[%s1185_s10 + $0x30] sm:$0xff]   ;;  %v954_v29 = vld [vmem:[%s1185_s10 + $0x28] sm:$0xff]   ;;  %vm520_vm1 = vcmask 556032   ;;  %vm527_vm2 = vcmask 1041408  }
  0x3d   : > { %531 = vmatprep.subr.bf16.mxu0 %v1028_v27  ;;  %866 = vmatprep.subr.bf16.mxu1 %v1028_v27  ;;  %v955_v30 = vld [vmem:[%s1185_s10 + $0x20] sm:$0xff]   ;;  %v956_v32 = vld [vmem:[%s1185_s10 + $0x18] sm:$0xff]   ;;  %v957_v34 = vld [vmem:[%s1185_s10 + $0x10] sm:$0xff]   ;;  %vm600_vm3 = vcmask 7168   ;;  %s862_s29 = sshll.u32 (%p1102_p6), %s1013_s18, 1 }
  0x3e   : > { %532 = vmatpush1.bf16.msra.mxu0 %v952_v26  ;;  %879 = vmatpush1.bf16.msra.mxu1 %v952_v26  ;;  %v967_v31 = vld [vmem:[%s1309_s0 + $0x4] ss:$8 sps:$4 sm:$0xff]   ;;  %v970_v33 = vld [vmem:[%s1309_s0 + $0x14] ss:$8 sps:$4 sm:$0xff]   ;;  %v965_v43 = vld [vmem:[%s1309_s0] ss:$8 sps:$4 sm:$0xff]   ;;  %s647_s30 = sadd.s32 (%p1102_p6), %s1009_s17, %s862_s29 }
  0x3f   : > { %533 = vmatprep.subr.bf16.mxu0 %v1028_v27  ;;  %867 = vmatprep.subr.bf16.mxu1 %v1028_v27  ;;  %v958_v35 = vld [vmem:[%s1185_s10 + $0x8] sm:$0xff]   ;;  %v959_v36 = vld [vmem:[%s1185_s10] sm:$0xff]   ;;  %v961_v39 = vld [vmem:[%s1185_s10 + $0x58] sm:$0xff]   ;;  %s863_s7 = sshll.u32 (%p1102_p6), %s647_s30, 3 }
  0x40   : > { %859 = vmatprep.mubr.msk.bf16.mxu0 %vm520_vm1, %v967_v31  ;;  %860 = vmatprep.mubr.msk.bf16.mxu1 %vm520_vm1, %v970_v33  ;;  %v960_v37 = vld [vmem:[%s1185_s10 + $0x60] ss:$0 sps:$4 sm:$0x33]   ;;  %v962_v40 = vld [vmem:[%s1185_s10 + $0x50] sm:$0xff]   ;;  %v963_v41 = vld [vmem:[%s1185_s10 + $0x48] sm:$0xff]  }
  0x41   : > { %v529_v38 = vsel %vm527_vm2, %v960_v37, 0  ;;  %v964_v42 = vld [vmem:[%s1185_s10 + $0x40] sm:$0xff]   ;;  %v968_v44 = vld [vmem:[%s1309_s0 + $0x10] ss:$8 sps:$4 sm:$0xff]  }
  0x42   : > { %534 = vmatpush1.bf16.msra.mxu0 %v953_v28  ;;  %880 = vmatpush1.bf16.msra.mxu1 %v953_v28  ;;  %v584_v57 = vld [vmem:[%s1178_s5] sm:$0xff]  ;;  %v586_v59 = vld [vmem:[%s1178_s5 + $0x10] sm:$0xff]  ;;  %v585_v60 = vld [vmem:[%s1178_s5 + $0x8] sm:$0xff] }
  0x43   : > { %535 = vmatprep.subr.bf16.mxu0 %v1028_v27  ;;  %868 = vmatprep.subr.bf16.mxu1 %v1028_v27  ;;  %v587_v61 = vld [vmem:[%s1178_s5 + $0x18] sm:$0xff]  ;;  %v605_v2 = vld [vmem:[%s1183_s9] sm:$0xff]  ;;  %v606_v6 = vld [vmem:[%s1183_s9 + $0x8] sm:$0xff] }
  0x44   : > { %v608_v7 = vld [vmem:[%s1183_s9 + $0x18] sm:$0xff]  ;;  %v607_v8 = vld [vmem:[%s1183_s9 + $0x10] sm:$0xff] }
  0x46   : > { %536 = vmatpush1.bf16.msra.mxu0 %v954_v29  ;;  %881 = vmatpush1.bf16.msra.mxu1 %v954_v29 }
  0x47   : > { %537 = vmatprep.subr.bf16.mxu0 %v1028_v27  ;;  %869 = vmatprep.subr.bf16.mxu1 %v1028_v27 }
  0x4a   : > { %538 = vmatpush1.bf16.msra.mxu0 %v955_v30  ;;  %882 = vmatpush1.bf16.msra.mxu1 %v955_v30 }
  0x4b   : > { %539 = vmatprep.subr.bf16.mxu0 %v1028_v27  ;;  %870 = vmatprep.subr.bf16.mxu1 %v1028_v27 }
  0x4e   : > { %540 = vmatpush1.bf16.msra.mxu0 %v956_v32  ;;  %883 = vmatpush1.bf16.msra.mxu1 %v956_v32 }
  0x4f   : > { %541 = vmatprep.subr.bf16.mxu0 %v1028_v27  ;;  %871 = vmatprep.subr.bf16.mxu1 %v1028_v27 }
  0x52   : > { %542 = vmatpush1.bf16.msra.mxu0 %v957_v34  ;;  %884 = vmatpush1.bf16.msra.mxu1 %v957_v34 }
  0x53   : > { %543 = vmatprep.subr.bf16.mxu0 %v1028_v27  ;;  %872 = vmatprep.subr.bf16.mxu1 %v1028_v27 }
  0x56   : > { %544 = vmatpush1.bf16.msra.mxu0 %v958_v35  ;;  %885 = vmatpush1.bf16.msra.mxu1 %v958_v35 }
  0x57   : > { %545 = vmatprep.subr.bf16.mxu0 %v1028_v27  ;;  %873 = vmatprep.subr.bf16.mxu1 %v1028_v27 }
  0x5a   : > { %546 = vmatpush1.bf16.msra.mxu0 %v959_v36  ;;  %886 = vmatpush1.bf16.msra.mxu1 %v959_v36 }
  0x5b   : > { %553 = vmatprep.subr.bf16.mxu0 %v1028_v27  ;;  %874 = vmatprep.subr.bf16.mxu1 %v1028_v27 }
  0x5e   : > { %554 = vmatpush2.bf16.msra.mxu0 %v529_v38  ;;  %887 = vmatpush2.bf16.msra.mxu1 %v529_v38 }
  0x5f   : > { %555 = vmatprep.subr.bf16.mxu0 %v1028_v27  ;;  %875 = vmatprep.subr.bf16.mxu1 %v1028_v27 }
  0x62   : > { %556 = vmatpush2.bf16.msra.mxu0 %v961_v39  ;;  %888 = vmatpush2.bf16.msra.mxu1 %v961_v39 }
  0x63   : > { %557 = vmatprep.subr.bf16.mxu0 %v1028_v27  ;;  %876 = vmatprep.subr.bf16.mxu1 %v1028_v27 }
  0x66   : > { %558 = vmatpush2.bf16.msra.mxu0 %v962_v40  ;;  %889 = vmatpush2.bf16.msra.mxu1 %v962_v40 }
  0x67   : > { %559 = vmatprep.subr.bf16.mxu0 %v1028_v27  ;;  %877 = vmatprep.subr.bf16.mxu1 %v1028_v27 }
  0x6a   : > { %560 = vmatpush2.bf16.msra.mxu0 %v963_v41  ;;  %890 = vmatpush2.bf16.msra.mxu1 %v963_v41 }
  0x6b   : > { %561 = vmatprep.subr.bf16.mxu0 %v1028_v27  ;;  %878 = vmatprep.subr.bf16.mxu1 %v1028_v27 }
  0x6e   : > { %562 = vmatpush2.bf16.msra.mxu0 %v964_v42  ;;  %891 = vmatpush2.bf16.msra.mxu1 %v964_v42 }
  0x71   : > { %564 = vmatmul.mubr.bf16.vlgmr.msra.gmra.mxu0 %v965_v43  ;;  %572 = vmatmul.mubr.bf16.vlgmr.msra.gmra.mxu1 %v968_v44 }
 0x131   : > { %v565_v45 = vpop.f32.mrf.mxu0  ;;  %v573_v46 = vpop.f32.mrf.mxu1 }
 0x132   : > { %580 = vst [vmem:[%s1187_s11] sm:$0xff] %v565_v45  ;;  %582 = vst [vmem:[%s1187_s11 + $0x10] sm:$0xff] %v573_v46  ;;  %588 = vadd.xlane.f32.xlu0 %v565_v45  ;;  %v611_v47 = vmul.f32 %v573_v46, %v573_v46  ;;  %v609_v54 = vmul.f32 %v565_v45, %v565_v45 }
 0x133   : > { %v567_v48 = vpop.f32.mrf.mxu0  ;;  %v575_v49 = vpop.f32.mrf.mxu1 }
 0x134   : > { %617 = vadd.xlane.f32.xlu1 %v611_v47 }
 0x135   : > { %v568_v50 = vpop.f32.mrf.mxu0  ;;  %v576_v51 = vpop.f32.mrf.mxu1 }
 0x136   : > { %581 = vst [vmem:[%s1187_s11 + $0x8] sm:$0xff] %v568_v50  ;;  %583 = vst [vmem:[%s1187_s11 + $0x18] sm:$0xff] %v576_v51  ;;  %592 = vadd.xlane.f32.xlu0 %v573_v46  ;;  %v610_v55 = vmul.f32 %v568_v50, %v568_v50  ;;  %v612_v56 = vmul.f32 %v576_v51, %v576_v51 }
 0x137   : > { %v570_v52 = vpop.f32.mrf.mxu0  ;;  %v578_v53 = vpop.f32.mrf.mxu1 }
 0x138   : > { %590 = vadd.xlane.f32.xlu1 %v568_v50 }
 0x139   : > { %v684_v17 = vld [vmem:[%s1187_s11] sm:$0xff] (%p1102_p6)  ;;  %v688_v19 = vld [vmem:[%s1187_s11 + $0x10] sm:$0xff] (%p1102_p6) }
 0x13a   : > { %613 = vadd.xlane.f32.xlu0 %v609_v54 }
 0x13c   : > { %615 = vadd.xlane.f32.xlu1 %v610_v55 }
 0x13d   : > { %v686_v18 = vld [vmem:[%s1187_s11 + $0x8] sm:$0xff] (%p1102_p6)  ;;  %v690_v20 = vld [vmem:[%s1187_s11 + $0x18] sm:$0xff] (%p1102_p6) }
 0x13e   : > { %594 = vadd.xlane.f32.xlu0 %v576_v51 }
 0x140   : > { %619 = vadd.xlane.f32.xlu1 %v612_v56 }
 0x1bb   : > { %v589_v58 = vpop.xlane.xlu0 %588 }
 0x1bc   : > { %v596_v62 = vadd.f32 %v589_v58, %v584_v57 }
 0x1bd   : > { %v618_v63 = vpop.xlane.xlu1 %617 }
 0x1be   : > { %601 = vst.msk [vmem:[%s1178_s5] sm:$0xff] %vm600_vm3, %v596_v62  ;;  %v623_v12 = vadd.f32 %v618_v63, %v607_v8 }
 0x1bf   : > { %v593_v0 = vpop.xlane.xlu0 %592 }
 0x1c0   : > { %v598_v4 = vadd.f32 %v593_v0, %v586_v59  ;;  %627 = vst.msk [vmem:[%s1183_s9 + $0x10] sm:$0xff] %vm600_vm3, %v623_v12 }
 0x1c1   : > { %v591_v1 = vpop.xlane.xlu1 %590 }
 0x1c2   : > { %v597_v3 = vadd.f32 %v591_v1, %v585_v60  ;;  %603 = vst.msk [vmem:[%s1178_s5 + $0x10] sm:$0xff] %vm600_vm3, %v598_v4 }
 0x1c3   : > { %v614_v5 = vpop.xlane.xlu0 %613 }
 0x1c4   : > { %v621_v9 = vadd.f32 %v614_v5, %v605_v2  ;;  %602 = vst.msk [vmem:[%s1178_s5 + $0x8] sm:$0xff] %vm600_vm3, %v597_v3 }
 0x1c5   : > { %v616_v10 = vpop.xlane.xlu1 %615 }
 0x1c6   : > { %v622_v11 = vadd.f32 %v616_v10, %v606_v6  ;;  %625 = vst.msk [vmem:[%s1183_s9] sm:$0xff] %vm600_vm3, %v621_v9 }
 0x1c7   : > { %v595_v13 = vpop.xlane.xlu0 %594 }
 0x1c8   : > { %v599_v14 = vadd.f32 %v595_v13, %v587_v61  ;;  %626 = vst.msk [vmem:[%s1183_s9 + $0x8] sm:$0xff] %vm600_vm3, %v622_v11  ;;  %645 = sbr.rel (!%p1102_p6) target bundleno = 463 (0x1cf), region = 77 }
 0x1c9   : > { %v620_v15 = vpop.xlane.xlu1 %619 }
 0x1ca   : > { %604 = vst.msk [vmem:[%s1178_s5 + $0x18] sm:$0xff] %vm600_vm3, %v599_v14  ;;  %v624_v16 = vadd.f32 %v620_v15, %v608_v7 }
 0x1cc   : > { %628 = vst.msk [vmem:[%s1183_s9 + $0x18] sm:$0xff] %vm600_vm3, %v624_v16  ;;  %s649_s9 = scalar_lea.vmem (%p1102_p6), %s1311_s2, %s863_s7 }
 0x1cd   : > { %685 = vst [vmem:[%s649_s9] sm:$0xff] %v684_v17  ;;  %687 = vst [vmem:[%s649_s9 + $0x20] sm:$0xff] %v686_v18 }
 0x1ce   : > { %689 = vst [vmem:[%s649_s9 + $0x40] sm:$0xff] %v688_v19  ;;  %691 = vst [vmem:[%s649_s9 + $0x60] sm:$0xff] %v690_v20 }
 0x1cf PF: > { %s15_s21 = sadd.s32 1, %s1025_s21   ;;  %s1315_s15 = smov %s1005_s16 }
 0x1d0   : > { %p12_p0 = scmp.ge.s32.totalorder %s15_s21, 6   ;;  %s1316_s16 = smov %s1110_s6 }
 0x1d1   : > { %s1317_s17 = smov %s1017_s19  ;;  %s1318_s18 = smov %s1021_s20 }
 0x1d2   : > { %s1319_s19 = smov %s1322_s22  ;;  %s1320_s20 = smov %s1326_s23 }
 0x1d3   :  { %14 = sbr.rel (!%p12_p0) target bundleno = 4 (0x4), region = 170 }

</bundles_post_ra>
